<compile_context>
chip_gen: v5e
topology: v5e:2x2
jax: 0.10.0
libtpu: 0.0.40
codegen_flags: <defaults>
</compile_context>

<pallas_src>
import functools

import jax
import jax.numpy as jnp
from jax import lax
from jax.experimental import pallas as pl
from jax.experimental.pallas import tpu as pltpu


def _pick_tile(n, max_tile):
    """Largest multiple-of-8 divisor of n that is <= max_tile, else n (full)."""
    if n <= max_tile:
        return n
    for t in range(max_tile - max_tile % 8, 7, -8):
        if n % t == 0:
            return t
    return n


def _qkv_proj_kernel(x_ref, w_ref, b_ref, q_ref, k_ref, v_ref, *, ghd):
    """Grid step = (batch b, sequence tile n, head group g).

    One fused GEMM (tn, C) @ (C, 3*ghd) -> (tn, 3*ghd) per step; the result is
    split into q/k/v with 128-lane-aligned static slices (lane-dense stores).
    """
    x = x_ref[0]                                              # (tn, C) bf16
    y = jnp.dot(x, w_ref[...], preferred_element_type=jnp.float32)
    y = (y + b_ref[...]).astype(q_ref.dtype)                  # (tn, 3*ghd)
    q_ref[0] = y[:, 0 * ghd:1 * ghd]
    k_ref[0] = y[:, 1 * ghd:2 * ghd]
    v_ref[0] = y[:, 2 * ghd:3 * ghd]


def _flash_attn_proj_kernel(q_ref, k_ref, v_ref, wp_ref, bp_ref, o_ref,
                            m_ref, l_ref, acc_ref, oacc_ref, *,
                            heads_per_group, head_dim):
    """Grid = (B, q-tile, head-group, kv-tile); online softmax over kv tiles,
    output projection fused as a reduction over head groups."""
    g = pl.program_id(2)
    ki = pl.program_id(3)
    num_groups = pl.num_programs(2)
    num_kv = pl.num_programs(3)

    @pl.when(jnp.logical_and(g == 0, ki == 0))
    def _():
        oacc_ref[...] = jnp.zeros(oacc_ref.shape, oacc_ref.dtype)

    @pl.when(ki == 0)
    def _():
        m_ref[...] = jnp.full(m_ref.shape, -jnp.inf, m_ref.dtype)
        l_ref[...] = jnp.zeros(l_ref.shape, l_ref.dtype)
        acc_ref[...] = jnp.zeros(acc_ref.shape, acc_ref.dtype)

    q = q_ref[0]                                  # (tq,  ghd) bf16, scale folded in
    k = k_ref[0]                                  # (tkv, ghd) bf16
    v = v_ref[0]                                  # (tkv, ghd) bf16

    for h in range(heads_per_group):              # static unroll; small (2 for SETR)
        lo, hi = h * head_dim, (h + 1) * head_dim
        # (tq, hd) x (tkv, hd) -> (tq, tkv), MXU with f32 accumulation.
        s = lax.dot_general(q[:, lo:hi], k[:, lo:hi],
                            (((1,), (1,)), ((), ())),
                            preferred_element_type=jnp.float32)
        m_prev = m_ref[h]                                        # (tq, 1)
        m_new = jnp.maximum(m_prev, jnp.max(s, axis=-1, keepdims=True))
        alpha = jnp.exp(m_prev - m_new)
        p = jnp.exp(s - m_new)                                   # f32 softmax math
        l_ref[h] = alpha * l_ref[h] + jnp.sum(p, axis=-1, keepdims=True)
        acc_ref[:, lo:hi] = alpha * acc_ref[:, lo:hi] + jnp.dot(
            p.astype(v.dtype), v[:, lo:hi], preferred_element_type=jnp.float32)
        m_ref[h] = m_new

    @pl.when(ki == num_kv - 1)
    def _():
        # Normalize each head of this group, then fold the output projection:
        # out_acc += ctx_group @ W_proj[rows of this head group].
        for h in range(heads_per_group):
            lo, hi = h * head_dim, (h + 1) * head_dim
            acc_ref[:, lo:hi] = acc_ref[:, lo:hi] * pl.reciprocal(
                l_ref[h], approx=True)
        ctx = acc_ref[...].astype(wp_ref.dtype)                  # (tq, ghd) bf16
        oacc_ref[...] += jnp.dot(ctx, wp_ref[...],
                                 preferred_element_type=jnp.float32)

        @pl.when(g == num_groups - 1)
        def _():
            o_ref[0] = (oacc_ref[...] + bp_ref[...]).astype(o_ref.dtype)


def setr_attention_pallas(x, qkv_weight, qkv_bias, proj_weight, proj_bias, *,
                          num_heads, compute_dtype=jnp.bfloat16,
                          q_tile=256, kv_tile=256, n_tile=512):
    """x: (B, N, C). PyTorch parameter layouts:
       qkv_weight (3C, C), qkv_bias (3C,), proj_weight (C, C), proj_bias (C,)."""
    B, N, C = x.shape
    assert C % num_heads == 0, "C must be divisible by num_heads"
    hd = C // num_heads
    scale = hd ** -0.5

    # Head grouping: smallest number of heads whose combined channel width is a
    # multiple of 128 lanes; falls back to all heads (width == C, full extent).
    G = num_heads
    for cand in range(1, num_heads + 1):
        if num_heads % cand == 0 and (cand * hd) % 128 == 0:
            G = cand
            break
    HG = num_heads // G
    ghd = G * hd

    tn = _pick_tile(N, n_tile)
    tq = _pick_tile(N, q_tile)
    tkv = _pick_tile(N, kv_tile)

    # Split the fused qkv weight (PyTorch (out, in)) into x @ W form; fold the
    # softmax scale into the q projection (weights AND bias) on the host, and
    # pre-interleave [q_g | k_g | v_g] per head group so kernel 1 does a single
    # (tn, C) @ (C, 3*ghd) GEMM per grid step with lane-aligned output slices.
    wq = qkv_weight[0 * C:1 * C, :].T * scale                    # (C, C)
    wk = qkv_weight[1 * C:2 * C, :].T
    wv = qkv_weight[2 * C:3 * C, :].T
    w_fused = jnp.concatenate(
        [wq.reshape(C, HG, ghd), wk.reshape(C, HG, ghd),
         wv.reshape(C, HG, ghd)], axis=2).reshape(C, 3 * C).astype(compute_dtype)

    bq = (qkv_bias[0 * C:1 * C] * scale).reshape(1, C)
    bk = qkv_bias[1 * C:2 * C].reshape(1, C)
    bv = qkv_bias[2 * C:3 * C].reshape(1, C)
    b_fused = jnp.concatenate(
        [bq.reshape(1, HG, ghd), bk.reshape(1, HG, ghd),
         bv.reshape(1, HG, ghd)], axis=2).reshape(1, 3 * C).astype(jnp.float32)

    wp = proj_weight.T.astype(compute_dtype)                     # (C, C)
    bp = proj_bias.reshape(1, C).astype(jnp.float32)
    xc = x.astype(compute_dtype)

    # ---- kernel 1: head-group-blocked fused QKV projection (bf16, f32 acc) ----
    qkv_kernel = functools.partial(_qkv_proj_kernel, ghd=ghd)
    q, k, v = pl.pallas_call(
        qkv_kernel,
        out_shape=tuple(jax.ShapeDtypeStruct((B, N, C), compute_dtype)
                        for _ in range(3)),
        grid_spec=pltpu.PrefetchScalarGridSpec(
            num_scalar_prefetch=0,
            grid=(B, N // tn, HG),
            in_specs=[
                pl.BlockSpec((1, tn, C), lambda b, n, g: (b, n, 0)),
                pl.BlockSpec((C, 3 * ghd), lambda b, n, g: (0, g)),
                pl.BlockSpec((1, 3 * ghd), lambda b, n, g: (0, g)),
            ],
            out_specs=[
                pl.BlockSpec((1, tn, ghd), lambda b, n, g: (b, n, g)),
                pl.BlockSpec((1, tn, ghd), lambda b, n, g: (b, n, g)),
                pl.BlockSpec((1, tn, ghd), lambda b, n, g: (b, n, g)),
            ],
        ),
        compiler_params=pltpu.CompilerParams(
            dimension_semantics=("parallel", "parallel", "parallel")),
    )(xc, w_fused, b_fused)

    # ---- kernel 2: flash attention + fused output projection ----
    kernel = functools.partial(_flash_attn_proj_kernel,
                               heads_per_group=G, head_dim=hd)
    out = pl.pallas_call(
        kernel,
        out_shape=jax.ShapeDtypeStruct((B, N, C), x.dtype),
        grid_spec=pltpu.PrefetchScalarGridSpec(
            num_scalar_prefetch=0,
            grid=(B, N // tq, HG, N // tkv),
            in_specs=[
                pl.BlockSpec((1, tq, ghd), lambda b, qi, g, ki: (b, qi, g)),
                pl.BlockSpec((1, tkv, ghd), lambda b, qi, g, ki: (b, ki, g)),
                pl.BlockSpec((1, tkv, ghd), lambda b, qi, g, ki: (b, ki, g)),
                pl.BlockSpec((ghd, C), lambda b, qi, g, ki: (g, 0)),
                pl.BlockSpec((1, C), lambda b, qi, g, ki: (0, 0)),
            ],
            out_specs=pl.BlockSpec((1, tq, C), lambda b, qi, g, ki: (b, qi, 0)),
            scratch_shapes=[
                pltpu.VMEM((G, tq, 1), jnp.float32),   # running max per head
                pltpu.VMEM((G, tq, 1), jnp.float32),   # running sum per head
                pltpu.VMEM((tq, ghd), jnp.float32),    # unnormalized ctx (group)
                pltpu.VMEM((tq, C), jnp.float32),      # f32 output accumulator
            ],
        ),
        compiler_params=pltpu.CompilerParams(
            dimension_semantics=("parallel", "parallel", "arbitrary",
                                 "arbitrary")),
    )(q, k, v, wp, bp)
    return out


def attention_reference(x, qkv_weight, qkv_bias, proj_weight, proj_bias, *,
                        num_heads):
    """Pure-JAX f32 reference mirroring the PyTorch Attention forward."""
    B, N, C = x.shape
    hd = C // num_heads
    scale = hd ** -0.5
    qkv = x @ qkv_weight.T + qkv_bias                           # (B, N, 3C)
    qkv = qkv.reshape(B, N, 3, num_heads, hd).transpose(2, 0, 3, 1, 4)
    q, k, v = qkv[0], qkv[1], qkv[2]                            # (B, H, N, hd)
    attn = jnp.einsum("bhqd,bhkd->bhqk", q, k) * scale
    attn = jax.nn.softmax(attn, axis=-1)
    ctx = jnp.einsum("bhqk,bhkd->bhqd", attn, v)
    ctx = ctx.transpose(0, 2, 1, 3).reshape(B, N, C)
    return ctx @ proj_weight.T + proj_bias


if __name__ == "__main__":
    # Small shapes that still exercise multi-tile q/kv, multiple head groups,
    # and the online-softmax / head-group-reduction paths.
    B, N, C = 2, 64, 256
    num_heads = 4                       # head_dim = 64 -> 2 heads per 128-lane group

    key = jax.random.PRNGKey(0)
    kx, kw1, kb1, kw2, kb2 = jax.random.split(key, 5)
    x = jax.random.normal(kx, (B, N, C), dtype=jnp.float32)
    qkv_weight = jax.random.normal(kw1, (3 * C, C), dtype=jnp.float32) * 0.05
    qkv_bias = jax.random.normal(kb1, (3 * C,), dtype=jnp.float32) * 0.05
    proj_weight = jax.random.normal(kw2, (C, C), dtype=jnp.float32) * 0.05
    proj_bias = jax.random.normal(kb2, (C,), dtype=jnp.float32) * 0.05

    out = setr_attention_pallas(x, qkv_weight, qkv_bias, proj_weight, proj_bias,
                                num_heads=num_heads,
                                q_tile=32, kv_tile=32, n_tile=64)
    out = jax.block_until_ready(out)

    ref = attention_reference(x, qkv_weight, qkv_bias, proj_weight, proj_bias,
                              num_heads=num_heads)
    assert out.shape == (B, N, C)
    max_err = jnp.max(jnp.abs(out - ref))
    # bf16 MXU inputs with f32 accumulation -> loosened tolerance vs f32 ref.
    assert jnp.allclose(out, ref, atol=5e-2, rtol=5e-2), \
        f"max abs err {max_err}"

    print("KERNEL_OK")
</pallas_src>

<mosaic_0001>
module attributes {stable_mosaic.version = 11 : i64} {
  func.func @_qkv_proj_kernel(%arg0: i32, %arg1: i32, %arg2: i32, %arg3: memref<1x64x256xbf16, #tpu.memory_space<vmem>>, %arg4: memref<256x384xbf16, #tpu.memory_space<vmem>>, %arg5: memref<1x384xf32, #tpu.memory_space<vmem>>, %arg6: memref<1x64x128xbf16, #tpu.memory_space<vmem>>, %arg7: memref<1x64x128xbf16, #tpu.memory_space<vmem>>, %arg8: memref<1x64x128xbf16, #tpu.memory_space<vmem>>) attributes {dimension_semantics = [#tpu.dimension_semantics<parallel>, #tpu.dimension_semantics<parallel>, #tpu.dimension_semantics<parallel>], iteration_bounds = array<i64: 2, 1, 2>, scalar_prefetch = 0 : i64, scratch_operands = 0 : i64, tpu.core_type = #tpu.core_type<tc>, window_params = [{transform_indices = @transform_0, window_bounds = array<i64: 1, 64, 256>}, {transform_indices = @transform_1, window_bounds = array<i64: 256, 384>}, {transform_indices = @transform_2, window_bounds = array<i64: 1, 384>}, {transform_indices = @transform_3, window_bounds = array<i64: 1, 64, 128>}, {transform_indices = @transform_4, window_bounds = array<i64: 1, 64, 128>}, {transform_indices = @transform_5, window_bounds = array<i64: 1, 64, 128>}]} {
    %c0 = arith.constant 0 : index
    %c0_0 = arith.constant 0 : index
    %c0_1 = arith.constant 0 : index
    %0 = vector.load %arg3[%c0, %c0_0, %c0_1] : memref<1x64x256xbf16, #tpu.memory_space<vmem>>, vector<1x64x256xbf16>
    %1 = vector.shape_cast %0 : vector<1x64x256xbf16> to vector<64x256xbf16>
    %c0_2 = arith.constant 0 : index
    %c0_3 = arith.constant 0 : index
    %2 = vector.load %arg4[%c0_2, %c0_3] : memref<256x384xbf16, #tpu.memory_space<vmem>>, vector<256x384xbf16>
    %cst = arith.constant dense<0.000000e+00> : vector<64x384xf32>
    %3 = tpu.matmul %1, %2, %cst {dimension_numbers = #tpu.dot_dimension_numbers<[1], [0], [0], [1], [0, 0, 1, 1], [], []>} : vector<64x256xbf16>, vector<256x384xbf16>, vector<64x384xf32> -> vector<64x384xf32>
    %c0_4 = arith.constant 0 : index
    %c0_5 = arith.constant 0 : index
    %4 = vector.load %arg5[%c0_4, %c0_5] : memref<1x384xf32, #tpu.memory_space<vmem>>, vector<1x384xf32>
    %5 = vector.broadcast %4 : vector<1x384xf32> to vector<64x384xf32>
    %6 = arith.addf %3, %5 : vector<64x384xf32>
    %7 = arith.truncf %6 : vector<64x384xf32> to vector<64x384xbf16>
    %8 = vector.extract_strided_slice %7 {offsets = [0, 0], sizes = [64, 128], strides = [1, 1]} : vector<64x384xbf16> to vector<64x128xbf16>
    %c0_6 = arith.constant 0 : index
    %c0_7 = arith.constant 0 : index
    %c0_8 = arith.constant 0 : index
    %9 = vector.load %arg6[%c0_6, %c0_7, %c0_8] : memref<1x64x128xbf16, #tpu.memory_space<vmem>>, vector<1x64x128xbf16>
    %10 = vector.shape_cast %9 : vector<1x64x128xbf16> to vector<64x128xbf16>
    %11 = vector.shape_cast %8 : vector<64x128xbf16> to vector<1x64x128xbf16>
    tpu.vector_store %arg6[%c0_6, %c0_7, %c0_8], %11 {strides = array<i32>} : memref<1x64x128xbf16, #tpu.memory_space<vmem>>, vector<1x64x128xbf16>,
    %12 = vector.extract_strided_slice %7 {offsets = [0, 128], sizes = [64, 128], strides = [1, 1]} : vector<64x384xbf16> to vector<64x128xbf16>
    %c0_9 = arith.constant 0 : index
    %c0_10 = arith.constant 0 : index
    %c0_11 = arith.constant 0 : index
    %13 = vector.load %arg7[%c0_9, %c0_10, %c0_11] : memref<1x64x128xbf16, #tpu.memory_space<vmem>>, vector<1x64x128xbf16>
    %14 = vector.shape_cast %13 : vector<1x64x128xbf16> to vector<64x128xbf16>
    %15 = vector.shape_cast %12 : vector<64x128xbf16> to vector<1x64x128xbf16>
    tpu.vector_store %arg7[%c0_9, %c0_10, %c0_11], %15 {strides = array<i32>} : memref<1x64x128xbf16, #tpu.memory_space<vmem>>, vector<1x64x128xbf16>,
    %16 = vector.extract_strided_slice %7 {offsets = [0, 256], sizes = [64, 128], strides = [1, 1]} : vector<64x384xbf16> to vector<64x128xbf16>
    %c0_12 = arith.constant 0 : index
    %c0_13 = arith.constant 0 : index
    %c0_14 = arith.constant 0 : index
    %17 = vector.load %arg8[%c0_12, %c0_13, %c0_14] : memref<1x64x128xbf16, #tpu.memory_space<vmem>>, vector<1x64x128xbf16>
    %18 = vector.shape_cast %17 : vector<1x64x128xbf16> to vector<64x128xbf16>
    %19 = vector.shape_cast %16 : vector<64x128xbf16> to vector<1x64x128xbf16>
    tpu.vector_store %arg8[%c0_12, %c0_13, %c0_14], %19 {strides = array<i32>} : memref<1x64x128xbf16, #tpu.memory_space<vmem>>, vector<1x64x128xbf16>,
    return
  }
  func.func @transform_0(%arg0: i32, %arg1: i32, %arg2: i32) -> (i32, i32, i32) {
    %c0_i32 = arith.constant 0 : i32
    %c0_i32_0 = arith.constant 0 : i32
    return %arg0, %arg1, %c0_i32 : i32, i32, i32
  }
  func.func @transform_1(%arg0: i32, %arg1: i32, %arg2: i32) -> (i32, i32) {
    %c0_i32 = arith.constant 0 : i32
    %c0_i32_0 = arith.constant 0 : i32
    return %c0_i32, %arg2 : i32, i32
  }
  func.func @transform_2(%arg0: i32, %arg1: i32, %arg2: i32) -> (i32, i32) {
    %c0_i32 = arith.constant 0 : i32
    %c0_i32_0 = arith.constant 0 : i32
    return %c0_i32, %arg2 : i32, i32
  }
  func.func @transform_3(%arg0: i32, %arg1: i32, %arg2: i32) -> (i32, i32, i32) {
    %c0_i32 = arith.constant 0 : i32
    return %arg0, %arg1, %arg2 : i32, i32, i32
  }
  func.func @transform_4(%arg0: i32, %arg1: i32, %arg2: i32) -> (i32, i32, i32) {
    %c0_i32 = arith.constant 0 : i32
    return %arg0, %arg1, %arg2 : i32, i32, i32
  }
  func.func @transform_5(%arg0: i32, %arg1: i32, %arg2: i32) -> (i32, i32, i32) {
    %c0_i32 = arith.constant 0 : i32
    return %arg0, %arg1, %arg2 : i32, i32, i32
  }
}

</mosaic_0001>

<bundles_post_ra>
// kernel: tpu_custom_call.1
= control target key start
LH: loop header
LB: loop body
LE: loop exit
PB: predicated region body
PF: predicated region fallthrough
CT: control target
= control target key end

     0   :  { %s2727_s0 = inlined_call_operand.hbm [shape: bf16[2,64,256], index: 0, kind: input, shape index: {}]   ;;  %s2728_s1 = inlined_call_operand.hbm [shape: bf16[256,768], index: 1, kind: input, shape index: {}]   ;;  %s2729_s2 = inlined_call_operand.hbm [shape: f32[1,768], index: 2, kind: input, shape index: {}]   ;;  %s2730_s3 = inlined_call_operand.hbm [shape: bf16[2,64,256], index: 3, kind: output, shape index: {0}]   ;;  %s2731_s4 = inlined_call_operand.hbm [shape: bf16[2,64,256], index: 4, kind: output, shape index: {1}]   ;;  %s2732_s5 = inlined_call_operand.hbm [shape: bf16[2,64,256], index: 5, kind: output, shape index: {2}]  }
   0x1   :  { %2746 = sst [smem:[#allocation28_spill]] %s2727_s0 }
   0x2   :  { %2747 = sst [smem:[#allocation29_spill]] %s2728_s1 }
   0x3   :  { %2748 = sst [smem:[#allocation30_spill]] %s2730_s3 }
   0x4   :  { %2749 = sst [smem:[#allocation31_spill]] %s2731_s4 }
   0x5   :  { %2750 = sst [smem:[#allocation32_spill]] %s2732_s5 }
   0x6   :  { %11 = vsyncpa [#allocation3], 0 }
   0x7   :  { %13 = vsyncpa [#allocation3 + $0x1], 0 }
   0x8   :  { %14 = vsyncpa [#allocation6], 0 }
   0x9   :  { %16 = vsyncpa [#allocation6 + $0x1], 0 }
   0xa   :  { %17 = vsyncpa [#allocation4], 0 }
   0xb   :  { %19 = vsyncpa [#allocation4 + $0x1], 0 }
   0xc   :  { %20 = vsyncpa [#allocation10], 0 }
   0xd   :  { %22 = vsyncpa [#allocation10 + $0x1], 0  ;;  %s2143_s18 = smov 0   ;;  %s2145_s19 = smov 0  }
   0xe   :  { %s2147_s20 = smov 0   ;;  %s2149_s21 = smov 0  }
   0xf   :  { %s2151_s22 = smov 0   ;;  %s2153_s23 = smov 0  }
  0x10   :  { %s2155_s24 = smov 0   ;;  %s2157_s25 = smov 0  }
  0x11   :  { %s2159_s26 = smov 0   ;;  %s2161_s27 = smov 0  }
  0x12   :  { %s2163_s28 = smov 0   ;;  %s2165_s29 = smov 0  }
  0x13   :  { %s2167_s30 = smov 0   ;;  %s2169_s6 = smov 0  }
  0x14 LB: > { %2751 = sst [smem:[#allocation16_spill]] %s2051_s18  ;;  %p64_p0 = scmp.eq.s32.totalorder %s2103_s6, 0  ;;  %s2103_s6 = sphi %s2169_s6, %s28_s6   ;;  %s2099_s30 = sphi %s2167_s30, %s2794_s30   ;;  %s2095_s29 = sphi %s2165_s29, %s2804_s29   ;;  %s2091_s28 = sphi %s2163_s28, %s2792_s28   ;;  %s2087_s27 = sphi %s2161_s27, %s2803_s27   ;;  %s2083_s26 = sphi %s2159_s26, %s2791_s26   ;;  %s2079_s25 = sphi %s2157_s25, %s2802_s25   ;;  %s2075_s24 = sphi %s2155_s24, %s2801_s24   ;;  %s2071_s23 = sphi %s2153_s23, %s2800_s23   ;;  %s2067_s22 = sphi %s2151_s22, %s2799_s22   ;;  %s2063_s21 = sphi %s2149_s21, %s2798_s21   ;;  %s2059_s20 = sphi %s2147_s20, %s2788_s20   ;;  %s2055_s19 = sphi %s2145_s19, %s2797_s19   ;;  %s2051_s18 = sphi %s2143_s18, %s2796_s18  }
  0x15   : > { %2752 = sst [smem:[#allocation17_spill]] %s2059_s20  ;;  %p89_p1 = scmp.ne.s32.totalorder %s2071_s23, %s2067_s22 }
  0x16   : > { %2753 = sst [smem:[#allocation18_spill]] %s2083_s26  ;;  %p95_p2 = scmp.ne.s32.totalorder %s2067_s22, %s2063_s21 }
  0x17   : > { %2754 = sst [smem:[#allocation19_spill]] %s2087_s27  ;;  %p91_p3 = por %p89_p1, %p64_p0 }
  0x18   : > { %2755 = sst [smem:[#allocation20_spill]] %s2099_s30  ;;  %p1681_p4 = scmp.lt.s32.totalorder %s2103_s6, 4 }
  0x19   : > { %s260_s9 = sand.u32 1, %s2103_s6   ;;  %s2733_s10 = sand.u32 1, %s2071_s23  }
  0x1a   : > { %s1645_s11 = smul.u32 384, %s2733_s10  ;;  %p2230_p5 = pnand %p1681_p4, %p91_p3 }
  0x1b   : > { %s1526_s12 = smul.u32 12, %s2095_s29  ;;  %s2757_s1 = sld [smem:[#allocation29_spill]] }
  0x1c   : > { %s264_s17 = scalar_lea.vmem [#allocation5], %s1645_s11  ;;  %s2237_s10 = scalar_lea.sflag [#allocation6], %s260_s9 }
  0x1d   : > { %s272_s8 = sshll.u32 %s264_s17, 4  ;;  %s2105_s14 = smov 384   ;;  %s273_s8 = int_to_ptr.vmem [resolvable:$true] %s272_s8 }
  0x1e   : > { %s2106_s15 = smov 192   ;;  %p1285_p6 = scmp.ge.s32.totalorder %s2103_s6, 1 }
  0x1f   : > { %p299_p7 = scmp.lt.s32.totalorder %s2103_s6, 5  ;;  %s2759_s17 = sadd.s32 1, %s2095_s29 }
  0x20   : > { %p41_p9 = scmp.ge.s32.totalorder %s2759_s17, 2  ;;  %s56_s5 = sadd.s32 1, %s2083_s26 }
  0x21   : > { %s269_s16 = scalar_lea.hbm %s2757_s1, %s1526_s12  ;;  %s2107_s12 = smov 12  }
  0x22   : > { %s270_s7 = sshll.u32 %s269_s16, 4  ;;  %p2244_p8 = pnand %p1285_p6, %p299_p7  ;;  %s271_s7 = int_to_ptr.hbm [resolvable:$true] %s270_s7 }
  0x23   : > { %1667 = dma.hbm_to_vmem [thread:$0]  (!%p2230_p5), %s271_s7, 6144, %s273_s8, %s2237_s10, %s2105_s14, %s2106_s15, %s2107_s12  }
  0x24   : > { %s2249_s16 = sadd.s32 4294967295, %s2103_s6   ;;  %s47_s1 = sadd.s32 1, %s2099_s30 }
  0x25   : > { %s2760_s4 = smov %s2759_s17  ;;  %s2808_s1 = smov (!%p41_p9, %s47_s1), %s2099_s30 }
  0x26   : > { %s2806_s4 = smov (%p41_p9, %s2760_s4), 0  ;;  %p63_p10 = scmp.ne.s32.totalorder %s2083_s26, %s2079_s25 }
  0x27   : > { %2761 = sst [smem:[#allocation21_spill]] %s2806_s4  ;;  %p69_p11 = scmp.ne.s32.totalorder %s2079_s25, %s2075_s24 }
  0x28   : > { %p49_p12 = scmp.ge.s32.totalorder %s2808_s1, 2  ;;  %p70_p13 = scmp.eq.s32.totalorder %s2249_s16, 0 }
  0x29   : > { %p2268_p1 = por %p64_p0, %p63_p10  ;;  %s79_s8 = ssub.s32 %s2095_s29, %s2806_s4 }
  0x2a   : > { %s2810_s1 = smov (%p49_p12, %s2808_s1), 0  ;;  %p2276_p3 = por %p70_p13, %p69_p11 }
  0x2b   : > { %2763 = sst [smem:[#allocation22_spill]] %s2810_s1  ;;  %p80_p6 = scmp.eq.s32.totalorder %s79_s8, 0 }
  0x2c   : > { %s51_s14 = ssub.s32 %s2099_s30, %s2810_s1  ;;  %p2285_p7 = por %p95_p2, %p70_p13 }
  0x2d   : > { %p54_p0 = scmp.eq.s32.totalorder %s51_s14, 0  ;;  %s135_s12 = sor.u32 %s79_s8, %s51_s14 }
  0x2e   : > { %s2766_s17 = sadd.s32 1, %s2071_s23  ;;  %p136_p9 = scmp.eq.s32.totalorder %s135_s12, 0 }
  0x2f   : > { %s2292_s9 = scalar_select %p80_p6, %s2071_s23, %s2766_s17  }
  0x30   : > { %s2295_s4 = scalar_select %p54_p0, %s2083_s26, %s56_s5  }
  0x31   : > { %2767 = sst [smem:[#allocation23_spill]] %s2292_s9  ;;  %s138_s3 = sadd.s32 1, %s2059_s20 }
  0x32   : > { %2768 = sst [smem:[#allocation24_spill]] %s2295_s4  ;;  %p148_p10 = scmp.ne.s32.totalorder %s2059_s20, %s2055_s19 }
  0x33   : > { %p149_p11 = scmp.eq.s32.totalorder %s2249_s16, 3  ;;  %p154_p12 = scmp.ne.s32.totalorder %s2055_s19, %s2051_s18 }
  0x34   : > { %s2302_s1 = scalar_select %p136_p9, %s2059_s20, %s138_s3  }
  0x35   : > { %p2304_p2 = por %p149_p11, %p148_p10  ;;  %s2772_s27 = sadd.s32 4294967294, %s2103_s6  }
  0x36   : > { %2769 = sst [smem:[#allocation25_spill]] %s2302_s1  ;;  %p155_p13 = scmp.eq.s32.totalorder %s2772_s27, 3 }
  0x37   : > { %s2770_s21 = scalar_select %p2304_p2, 1, 0 }
  0x38   : > { %s235_s8 = sand.u32 1, %s2083_s26   ;;  %p2313_p6 = por %p155_p13, %p154_p12 }
  0x39   : > { %2771 = sst [smem:[#allocation26_spill]] %s2770_s21  ;;  %s1281_s5 = sshll.u32 %s235_s8, 6 }
  0x3a   : > { %s2773_s14 = scalar_select %p2313_p6, 1, 0 }
  0x3b   : > { %s1525_s12 = sshll.u32 %s2099_s30, 6  ;;  %s239_s17 = scalar_lea.vmem [#allocation2], %s1281_s5 }
  0x3c   : > { %2774 = sst [smem:[#allocation27_spill]] %s2773_s14  ;;  %s250_s4 = sshll.u32 %s239_s17, 4  ;;  %s251_s4 = int_to_ptr.vmem [resolvable:$true] %s250_s4 }
  0x3d   : > { %s2775_s0 = sld [smem:[#allocation28_spill]]  ;;  %p1662_p0 = pnand %p1681_p4, %p2268_p1 }
  0x3e   : > { %s236_s27 = scalar_lea.sflag [#allocation3], %s235_s8  ;;  %s2108_s26 = smov 128  }
  0x3f   : > { %s2109_s18 = smov 8   ;;  %s2776_s14 = sand.u32 1, %s2071_s23  }
  0x40   : > { %s1646_s30 = smul.u32 3, %s2776_s14 }
  0x41   : > { %s287_s5 = smul.u32 3, %s2095_s29 }
  0x43   : > { %s247_s1 = scalar_lea.hbm %s2775_s0, %s1525_s12  ;;  %s290_s9 = scalar_lea.hbm %s2729_s2, %s287_s5 }
  0x44   : > { %s248_s20 = sshll.u32 %s247_s1, 4  ;;  %s286_s12 = scalar_lea.vmem [#allocation7], %s1646_s30  ;;  %s249_s20 = int_to_ptr.hbm [resolvable:$true] %s248_s20 }
  0x45   : > { %1664 = dma.hbm_to_vmem [thread:$0]  (!%p1662_p0), %s249_s20, 1024, %s251_s4, %s236_s27, %s2108_s26, %s2108_s26, %s2109_s18  }
  0x46   : > { %s294_s3 = sshll.u32 %s286_s12, 4  ;;  %s292_s0 = sshll.u32 %s290_s9, 4  ;;  %s295_s3 = int_to_ptr.vmem [resolvable:$true] %s294_s3  ;;  %s293_s0 = int_to_ptr.hbm [resolvable:$true] %s292_s0 }
  0x47   : > { %1670 = dma.hbm_to_vmem [thread:$0]  (!%p2230_p5), %s293_s0, 48, %s295_s3, %s2237_s10  }
  0x48   : > { %303 = sbr.rel (%p2244_p8) target bundleno = 360 (0x168), region = 32  ;;  %s305_s1 = sand.u32 (!%p2244_p8), 1, %s2079_s25  }
  0x49   : > { %s1286_s4 = sshll.u32 (!%p2244_p8), %s305_s1, 6  ;;  %s306_s18 = scalar_lea.sflag (!%p2244_p8), [#allocation3], %s305_s1 }
  0x4a   : > { %s2337_s20 = scalar_lea.vmem (!%p2244_p8), [#allocation2], %s1286_s4 }
  0x4d   : > { %2034 = dma.done.wait (%p2276_p3), %s306_s18, 1024  }
  0x4e   : > { %2036 = vsyncadd (%p2276_p3), %s306_s18, 4294966272  ;;  %s315_s0 = sand.u32 1, %s2249_s16   ;;  %s317_s26 = sand.u32 1, %s2067_s22  }
  0x4f   : > { %s1647_s30 = smul.u32 384, %s317_s26  ;;  %s316_s10 = scalar_lea.sflag [#allocation6], %s315_s0 }
  0x51   : > { %s2349_s13 = scalar_lea.vmem [#allocation5], %s1647_s30 }
  0x52   : > { %2038 = dma.done.wait (%p2285_p7), %s316_s10, 6192  }
  0x53   : > { %2040 = vsyncadd (%p2285_p7), %s316_s10, 4294961104  ;;  %v1408_v0 = vld [vmem:[%s2349_s13 + $0xa8] sm:$0xf]  ;;  %v1557_v1 = vld [vmem:[%s2349_s13 + $0xb0] sm:$0xf0]  ;;  %s1648_s11 = smul.u32 3, %s317_s26 }
  0x54   : > { %v1504_v2 = vld [vmem:[%s2349_s13 + $0x168] sm:$0xf]  ;;  %v1409_v3 = vor.u32 %v1557_v1, %v1408_v0  ;;  %v1581_v4 = vld [vmem:[%s2349_s13 + $0x170] sm:$0xf0]  ;;  %v1396_v5 = vld [vmem:[%s2349_s13 + $0x90] sm:$0xf] }
  0x55   : > { %v1554_v6 = vld [vmem:[%s2349_s13 + $0x98] sm:$0xf0]  ;;  %v1505_v7 = vor.u32 %v1581_v4, %v1504_v2  ;;  %v1492_v8 = vld [vmem:[%s2349_s13 + $0x150] sm:$0xf]  ;;  %v1384_v12 = vld [vmem:[%s2349_s13 + $0x78] sm:$0xf] }
  0x56   : > { %v1578_v9 = vld [vmem:[%s2349_s13 + $0x158] sm:$0xf0]  ;;  %1629 = vmatpush.bf16.msra.mxu2 %v1409_v3  ;;  %759 = vmatpush.bf16.msra.mxu0 %v1409_v3  ;;  %v1397_v10 = vor.u32 %v1554_v6, %v1396_v5  ;;  %v1551_v13 = vld [vmem:[%s2349_s13 + $0x80] sm:$0xf0]  ;;  %v1480_v14 = vld [vmem:[%s2349_s13 + $0x138] sm:$0xf] }
  0x57   : > { %1637 = vmatpush.bf16.msra.mxu3 %v1505_v7  ;;  %788 = vmatpush.bf16.msra.mxu1 %v1505_v7  ;;  %v1493_v11 = vor.u32 %v1578_v9, %v1492_v8  ;;  %v1575_v15 = vld [vmem:[%s2349_s13 + $0x140] sm:$0xf0]  ;;  %v1385_v16 = vor.u32 %v1551_v13, %v1384_v12  ;;  %v1372_v18 = vld [vmem:[%s2349_s13 + $0x60] sm:$0xf]  ;;  %v1548_v19 = vld [vmem:[%s2349_s13 + $0x68] sm:$0xf0] }
  0x58   : > { %v1481_v17 = vor.u32 %v1575_v15, %v1480_v14  ;;  %v1468_v20 = vld [vmem:[%s2349_s13 + $0x120] sm:$0xf]  ;;  %v1572_v21 = vld [vmem:[%s2349_s13 + $0x128] sm:$0xf0]  ;;  %v1373_v22 = vor.u32 %v1548_v19, %v1372_v18  ;;  %v1360_v24 = vld [vmem:[%s2349_s13 + $0x48] sm:$0xf] }
  0x59   : > { %v1469_v23 = vor.u32 %v1572_v21, %v1468_v20  ;;  %v1545_v25 = vld [vmem:[%s2349_s13 + $0x50] sm:$0xf0]  ;;  %v1456_v26 = vld [vmem:[%s2349_s13 + $0x108] sm:$0xf]  ;;  %v1348_v30 = vld [vmem:[%s2349_s13 + $0x30] sm:$0xf] }
  0x5a   : > { %1630 = vmatpush.bf16.msra.mxu2 %v1397_v10  ;;  %760 = vmatpush.bf16.msra.mxu0 %v1397_v10  ;;  %v1569_v27 = vld [vmem:[%s2349_s13 + $0x110] sm:$0xf0]  ;;  %v1361_v28 = vor.u32 %v1545_v25, %v1360_v24  ;;  %v1542_v31 = vld [vmem:[%s2349_s13 + $0x38] sm:$0xf0]  ;;  %v1444_v32 = vld [vmem:[%s2349_s13 + $0xf0] sm:$0xf] }
  0x5b   : > { %1638 = vmatpush.bf16.msra.mxu3 %v1493_v11  ;;  %789 = vmatpush.bf16.msra.mxu1 %v1493_v11  ;;  %v1457_v29 = vor.u32 %v1569_v27, %v1456_v26  ;;  %v1566_v33 = vld [vmem:[%s2349_s13 + $0xf8] sm:$0xf0]  ;;  %v1349_v34 = vor.u32 %v1542_v31, %v1348_v30  ;;  %v1336_v36 = vld [vmem:[%s2349_s13 + $0x18] sm:$0xf]  ;;  %v1539_v37 = vld [vmem:[%s2349_s13 + $0x20] sm:$0xf0] }
  0x5c   : > { %v1445_v35 = vor.u32 %v1566_v33, %v1444_v32  ;;  %v1432_v38 = vld [vmem:[%s2349_s13 + $0xd8] sm:$0xf]  ;;  %v1563_v39 = vld [vmem:[%s2349_s13 + $0xe0] sm:$0xf0]  ;;  %v1337_v40 = vor.u32 %v1539_v37, %v1336_v36  ;;  %v1324_v41 = vld [vmem:[%s2349_s13] sm:$0xf] }
  0x5d   : > { %v1433_v42 = vor.u32 %v1563_v39, %v1432_v38  ;;  %v1536_v43 = vld [vmem:[%s2349_s13 + $0x8] sm:$0xf0]  ;;  %v1420_v44 = vld [vmem:[%s2349_s13 + $0xc0] sm:$0xf]  ;;  %v1532_v47 = vld [vmem:[%s2337_s20 + $0x24] sm:$0xf0] }
  0x5e   : > { %1631 = vmatpush.bf16.msra.mxu2 %v1385_v16  ;;  %761 = vmatpush.bf16.msra.mxu0 %v1385_v16  ;;  %v1560_v45 = vld [vmem:[%s2349_s13 + $0xc8] sm:$0xf0]  ;;  %v1308_v46 = vld [vmem:[%s2337_s20 + $0x20] sm:$0xf]  ;;  %v1410_v49 = vld [vmem:[%s2349_s13 + $0xb4] sm:$0xf0]  ;;  %v1325_v52 = vor.u32 %v1536_v43, %v1324_v41 }
  0x5f   : > { %1639 = vmatpush.bf16.msra.mxu3 %v1481_v17  ;;  %790 = vmatpush.bf16.msra.mxu1 %v1481_v17  ;;  %v1556_v48 = vld [vmem:[%s2349_s13 + $0xac] sm:$0xf]  ;;  %v1506_v51 = vld [vmem:[%s2349_s13 + $0x174] sm:$0xf0]  ;;  %v1531_v53 = vld [vmem:[%s2337_s20 + $0x24] sm:$0xf]  ;;  %v1421_v56 = vor.u32 %v1560_v45, %v1420_v44  ;;  %v2402_v1 = vor.u32 %v1532_v47, %v1308_v46 }
  0x60   : > { %v1580_v50 = vld [vmem:[%s2349_s13 + $0x16c] sm:$0xf]  ;;  %v1292_v54 = vld [vmem:[%s2337_s20] sm:$0xf]  ;;  %v1528_v55 = vld [vmem:[%s2337_s20 + $0x4] sm:$0xf0]  ;;  %v1413_v60 = vor.u32 %v1556_v48, %v1410_v49 }
  0x61   : > { %v1310_v57 = vld [vmem:[%s2337_s20 + $0x28] sm:$0xf0]  ;;  %v1416_v58 = vld [vmem:[%s2349_s13 + $0xb0] sm:$0xf]  ;;  %v1558_v59 = vld [vmem:[%s2349_s13 + $0xb8] sm:$0xf0]  ;;  %v1509_v61 = vor.u32 %v1580_v50, %v1506_v51  ;;  %v2404_v2 = vor.u32 %v1528_v55, %v1292_v54 }
  0x62   : > { %1632 = vmatpush.bf16.msra.mxu2 %v1373_v22  ;;  %762 = vmatpush.bf16.msra.mxu0 %v1373_v22  ;;  %v1527_v62 = vld [vmem:[%s2337_s20 + $0x4] sm:$0xf]  ;;  %v1294_v63 = vld [vmem:[%s2337_s20 + $0x8] sm:$0xf0]  ;;  %v1553_v0 = vld [vmem:[%s2349_s13 + $0x94] sm:$0xf]  ;;  %v2409_v6 = vor.u32 %v1531_v53, %v1310_v57  ;;  %v1417_v7 = vor.u32 %v1558_v59, %v1416_v58 }
  0x63   : > { %1640 = vmatpush.bf16.msra.mxu3 %v1469_v23  ;;  %791 = vmatpush.bf16.msra.mxu1 %v1469_v23  ;;  %v1398_v3 = vld [vmem:[%s2349_s13 + $0x9c] sm:$0xf0]  ;;  %v1512_v4 = vld [vmem:[%s2349_s13 + $0x170] sm:$0xf]  ;;  %v1582_v5 = vld [vmem:[%s2349_s13 + $0x178] sm:$0xf0]  ;;  %v2413_v10 = vor.u32 %v1527_v62, %v1294_v63 }
  0x64   : > { %v1577_v8 = vld [vmem:[%s2349_s13 + $0x154] sm:$0xf]  ;;  %v1494_v9 = vld [vmem:[%s2349_s13 + $0x15c] sm:$0xf0]  ;;  %v1404_v11 = vld [vmem:[%s2349_s13 + $0x98] sm:$0xf]  ;;  %v1401_v13 = vor.u32 %v1553_v0, %v1398_v3  ;;  %v1513_v14 = vor.u32 %v1582_v5, %v1512_v4 }
  0x65   : > { %v1555_v12 = vld [vmem:[%s2349_s13 + $0xa0] sm:$0xf0]  ;;  %v1550_v15 = vld [vmem:[%s2349_s13 + $0x7c] sm:$0xf]  ;;  %v1497_v16 = vor.u32 %v1577_v8, %v1494_v9  ;;  %v1386_v17 = vld [vmem:[%s2349_s13 + $0x84] sm:$0xf0] }
  0x66   : > { %1633 = vmatpush.bf16.msra.mxu2 %v1361_v28  ;;  %763 = vmatpush.bf16.msra.mxu0 %v1361_v28  ;;  %v1500_v18 = vld [vmem:[%s2349_s13 + $0x158] sm:$0xf]  ;;  %v1579_v19 = vld [vmem:[%s2349_s13 + $0x160] sm:$0xf0]  ;;  %v1405_v20 = vor.u32 %v1555_v12, %v1404_v11  ;;  %v1574_v21 = vld [vmem:[%s2349_s13 + $0x13c] sm:$0xf]  ;;  %v1389_v25 = vor.u32 %v1550_v15, %v1386_v17 }
  0x67   : > { %1641 = vmatpush.bf16.msra.mxu3 %v1457_v29  ;;  %792 = vmatpush.bf16.msra.mxu1 %v1457_v29  ;;  %v1482_v22 = vld [vmem:[%s2349_s13 + $0x144] sm:$0xf0]  ;;  %v1392_v23 = vld [vmem:[%s2349_s13 + $0x80] sm:$0xf]  ;;  %v1552_v24 = vld [vmem:[%s2349_s13 + $0x88] sm:$0xf0]  ;;  %v1501_v26 = vor.u32 %v1579_v19, %v1500_v18 }
  0x68   : > { %v1547_v27 = vld [vmem:[%s2349_s13 + $0x64] sm:$0xf]  ;;  %v1485_v28 = vor.u32 %v1574_v21, %v1482_v22  ;;  %v1374_v29 = vld [vmem:[%s2349_s13 + $0x6c] sm:$0xf0]  ;;  %v1488_v30 = vld [vmem:[%s2349_s13 + $0x140] sm:$0xf]  ;;  %v1393_v32 = vor.u32 %v1552_v24, %v1392_v23 }
  0x69   : > { %v1576_v31 = vld [vmem:[%s2349_s13 + $0x148] sm:$0xf0]  ;;  %v1571_v33 = vld [vmem:[%s2349_s13 + $0x124] sm:$0xf]  ;;  %v1549_v36 = vld [vmem:[%s2349_s13 + $0x70] sm:$0xf0]  ;;  %v1377_v37 = vor.u32 %v1547_v27, %v1374_v29 }
  0x6a   : > { %1634 = vmatpush.bf16.msra.mxu2 %v1349_v34  ;;  %764 = vmatpush.bf16.msra.mxu0 %v1349_v34  ;;  %v1470_v34 = vld [vmem:[%s2349_s13 + $0x12c] sm:$0xf0]  ;;  %v1489_v38 = vor.u32 %v1576_v31, %v1488_v30  ;;  %v1544_v41 = vld [vmem:[%s2349_s13 + $0x4c] sm:$0xf]  ;;  %v1533_v43 = vld [vmem:[%s2337_s20 + $0x34] sm:$0xf] }
  0x6b   : > { %1642 = vmatpush.bf16.msra.mxu3 %v1445_v35  ;;  %793 = vmatpush.bf16.msra.mxu1 %v1445_v35  ;;  %v1380_v35 = vld [vmem:[%s2349_s13 + $0x68] sm:$0xf]  ;;  %v1316_v39 = vld [vmem:[%s2337_s20 + $0x30] sm:$0xf]  ;;  %v1318_v44 = vld [vmem:[%s2337_s20 + $0x38] sm:$0xf0] }
  0x6c   : > { %v1362_v45 = vld [vmem:[%s2349_s13 + $0x54] sm:$0xf0]  ;;  %v1476_v46 = vld [vmem:[%s2349_s13 + $0x128] sm:$0xf]  ;;  %v1573_v47 = vld [vmem:[%s2349_s13 + $0x130] sm:$0xf0]  ;;  %v1381_v48 = vor.u32 %v1549_v36, %v1380_v35  ;;  %v2461_v3 = vor.u32 %v1533_v43, %v1318_v44 }
  0x6d   : > { %v1300_v49 = vld [vmem:[%s2337_s20 + $0x10] sm:$0xf]  ;;  %v1530_v50 = vld [vmem:[%s2337_s20 + $0x14] sm:$0xf0]  ;;  %v1568_v51 = vld [vmem:[%s2349_s13 + $0x10c] sm:$0xf]  ;;  %v1365_v55 = vor.u32 %v1544_v41, %v1362_v45 }
  0x6e   : > { %1635 = vmatpush.bf16.msra.mxu2 %v1337_v40  ;;  %765 = vmatpush.bf16.msra.mxu0 %v1337_v40  ;;  %v1534_v40 = vld [vmem:[%s2337_s20 + $0x34] sm:$0xf0]  ;;  %v1368_v53 = vld [vmem:[%s2349_s13 + $0x50] sm:$0xf]  ;;  %v1546_v54 = vld [vmem:[%s2349_s13 + $0x58] sm:$0xf0] }
  0x6f   : > { %1643 = vmatpush.bf16.msra.mxu3 %v1433_v42  ;;  %794 = vmatpush.bf16.msra.mxu1 %v1433_v42  ;;  %v1473_v42 = vor.u32 %v1571_v33, %v1470_v34  ;;  %v1529_v57 = vld [vmem:[%s2337_s20 + $0x14] sm:$0xf]  ;;  %v1302_v58 = vld [vmem:[%s2337_s20 + $0x18] sm:$0xf0]  ;;  %v1350_v62 = vld [vmem:[%s2349_s13 + $0x3c] sm:$0xf0]  ;;  %v1369_v4 = vor.u32 %v1546_v54, %v1368_v53 }
  0x70   : > { %v1541_v59 = vld [vmem:[%s2349_s13 + $0x34] sm:$0xf]  ;;  %v1464_v63 = vld [vmem:[%s2349_s13 + $0x110] sm:$0xf]  ;;  %v1570_v0 = vld [vmem:[%s2349_s13 + $0x118] sm:$0xf0] }
  0x71   : > { %v1356_v8 = vld [vmem:[%s2349_s13 + $0x38] sm:$0xf]  ;;  %v1543_v9 = vld [vmem:[%s2349_s13 + $0x40] sm:$0xf0]  ;;  %v1353_v11 = vor.u32 %v1541_v59, %v1350_v62  ;;  %v1465_v12 = vor.u32 %v1570_v0, %v1464_v63  ;;  %v1538_v15 = vld [vmem:[%s2349_s13 + $0x1c] sm:$0xf] }
  0x72   : > { %1636 = vmatpush.bf16.msra.mxu2 %v1325_v52  ;;  %766 = vmatpush.bf16.msra.mxu0 %v1325_v52  ;;  %v1458_v52 = vld [vmem:[%s2349_s13 + $0x114] sm:$0xf0]  ;;  %v1567_v18 = vld [vmem:[%s2349_s13 + $0x100] sm:$0xf0]  ;;  %v1357_v19 = vor.u32 %v1543_v9, %v1356_v8  ;;  %v1344_v21 = vld [vmem:[%s2349_s13 + $0x20] sm:$0xf] }
  0x73   : > { %1644 = vmatpush.bf16.msra.mxu3 %v1421_v56  ;;  %795 = vmatpush.bf16.msra.mxu1 %v1421_v56  ;;  %v1477_v56 = vor.u32 %v1573_v47, %v1476_v46  ;;  %v1461_v5 = vor.u32 %v1568_v51, %v1458_v52  ;;  %v1452_v17 = vld [vmem:[%s2349_s13 + $0xf8] sm:$0xf]  ;;  %v1540_v22 = vld [vmem:[%s2349_s13 + $0x28] sm:$0xf0]  ;;  %v1535_v27 = vld [vmem:[%s2349_s13 + $0x4] sm:$0xf] }
  0x74   : > { %v1453_v24 = vor.u32 %v1567_v18, %v1452_v17  ;;  %v1440_v29 = vld [vmem:[%s2349_s13 + $0xe0] sm:$0xf]  ;;  %v1564_v30 = vld [vmem:[%s2349_s13 + $0xe8] sm:$0xf0]  ;;  %v1345_v31 = vor.u32 %v1540_v22, %v1344_v21  ;;  %v1332_v33 = vld [vmem:[%s2349_s13 + $0x8] sm:$0xf] }
  0x75   : > { %777 = vmatmul.bf16.vlgmr.msra.gmra.mxu2 %v2402_v1  ;;  %767 = vmatmul.bf16.vlgmr.msra.gmra.mxu0 %v2404_v2  ;;  %v1537_v34 = vld [vmem:[%s2349_s13 + $0x10] sm:$0xf0]  ;;  %v1441_v36 = vor.u32 %v1564_v30, %v1440_v29  ;;  %s329_s7 = scalar_lea.vmem [#allocation7], %s1648_s11  ;;  %s360_s24 = sand.u32 1, %s2055_s19  }
  0x76   : > { %817 = vmatpush.bf16.msrb.mxu2 %v1413_v60  ;;  %806 = vmatmul.bf16.vlgmr.msra.gmra.mxu3 %v2409_v6  ;;  %v2454_v60 = vor.u32 %v1534_v40, %v1316_v39  ;;  %v1428_v39 = vld [vmem:[%s2349_s13 + $0xc8] sm:$0xf]  ;;  %v1561_v40 = vld [vmem:[%s2349_s13 + $0xd0] sm:$0xf0]  ;;  %v1333_v41 = vor.u32 %v1537_v34, %v1332_v33  ;;  %s2514_s15 = sshll.u32 %s360_s24, 5  ;;  %s2777_s21 = sld [smem:[#allocation19_spill]] }
  0x77   : > { %846 = vmatpush.bf16.msrb.mxu3 %v1509_v61  ;;  %875 = vmatpush.bf16.msrb.mxu0 %v1417_v7  ;;  %v2456_v61 = vor.u32 %v1530_v50, %v1300_v49  ;;  %v2463_v7 = vor.u32 %v1529_v57, %v1302_v58  ;;  %v1429_v43 = vor.u32 %v1561_v40, %v1428_v39  ;;  %s2521_s8 = scalar_lea.vmem [#allocation8], %s2514_s15  ;;  %s1517_s14 = sshll.u32 %s2091_s28, 4 }
  0x78   : > { %796 = vmatmul.bf16.vlgmr.msra.gmra.mxu1 %v2413_v10  ;;  %s2778_s9 = sld [smem:[#allocation30_spill]]  ;;  %s1024_s3 = sshll.u32 %s2521_s8, 4  ;;  %s2549_s3 = int_to_ptr.vmem [resolvable:$true] %s1024_s3 }
  0x79   : > { %904 = vmatpush.bf16.msrb.mxu1 %v1513_v14  ;;  %v1446_v14 = vld [vmem:[%s2349_s13 + $0xfc] sm:$0xf0]  ;;  %s998_s18 = scalar_lea.sflag [#allocation4], %s360_s24 }
  0x7a   : > { %818 = vmatpush.bf16.msrb.mxu2 %v1401_v13  ;;  %v1565_v13 = vld [vmem:[%s2349_s13 + $0xf4] sm:$0xf] }
  0x7b   : > { %847 = vmatpush.bf16.msrb.mxu3 %v1497_v16  ;;  %876 = vmatpush.bf16.msrb.mxu0 %v1405_v20  ;;  %v1338_v16 = vld [vmem:[%s2349_s13 + $0x24] sm:$0xf0]  ;;  %v1449_v20 = vor.u32 %v1565_v13, %v1446_v14 }
  0x7c   : > { %v1341_v23 = vor.u32 %v1538_v15, %v1338_v16  ;;  %s1021_s27 = sadd.s32 %s2777_s21, %s1517_s14 }
  0x7d   : > { %905 = vmatpush.bf16.msrb.mxu1 %v1501_v26  ;;  %v1434_v26 = vld [vmem:[%s2349_s13 + $0xe4] sm:$0xf0]  ;;  %s2535_s5 = sshll.u32 %s1021_s27, 2 }
  0x7e   : > { %819 = vmatpush.bf16.msrb.mxu2 %v1389_v25  ;;  %v1562_v25 = vld [vmem:[%s2349_s13 + $0xdc] sm:$0xf]  ;;  %s1023_s12 = scalar_lea.hbm %s2778_s9, %s2535_s5 }
  0x7f   : > { %848 = vmatpush.bf16.msrb.mxu3 %v1485_v28  ;;  %877 = vmatpush.bf16.msrb.mxu0 %v1393_v32  ;;  %v1326_v28 = vld [vmem:[%s2349_s13 + $0xc] sm:$0xf0]  ;;  %v1437_v32 = vor.u32 %v1562_v25, %v1434_v26  ;;  %s2547_s1 = sshll.u32 %s1023_s12, 4  ;;  %s1027_s1 = int_to_ptr.hbm [resolvable:$true] %s2547_s1 }
  0x80   : > { %v1329_v35 = vor.u32 %v1535_v27, %v1326_v28  ;;  %s1907_s20 = sshra.s32 %s1027_s1, 4  ;;  %s1908_s20 = int_to_ptr.hbm [resolvable:$true] %s1907_s20 }
  0x81   : > { %906 = vmatpush.bf16.msrb.mxu1 %v1489_v38  ;;  %v1422_v38 = vld [vmem:[%s2349_s13 + $0xcc] sm:$0xf0]  ;;  %s1909_s26 = scalar_lea.hbm %s1908_s20, 32  ;;  %p1914_p1 = scmp.lt.s32.totalorder %s1908_s20, %s2778_s9 }
  0x82   : > { %820 = vmatpush.bf16.msrb.mxu2 %v1377_v37  ;;  %v1559_v37 = vld [vmem:[%s2349_s13 + $0xc4] sm:$0xf]  ;;  %p1910_p4 = scmp.ne.s32.totalorder %s1908_s20, %s1909_s26  ;;  %s1913_s13 = scalar_lea.hbm %s2778_s9, 128 }
  0x83   : > { %849 = vmatpush.bf16.msrb.mxu3 %v1473_v42  ;;  %878 = vmatpush.bf16.msrb.mxu0 %v1381_v48  ;;  %v1425_v42 = vor.u32 %v1559_v37, %v1422_v38  ;;  %p1915_p3 = scmp.lt.s32.totalorder %s1913_s13, %s1909_s26 }
  0x84   : > { %p1911_p5 = pnand %p1910_p4, %p2304_p2 }
  0x85   : > { %907 = vmatpush.bf16.msrb.mxu1 %v1477_v56  ;;  %782 = vmatmul.bf16.gmra.mxu2 %v2454_v60  ;;  %p1916_p7 = por %p1915_p3, %p1914_p1 }
  0x86   : > { %821 = vmatpush.bf16.msrb.mxu2 %v1365_v55  ;;  %772 = vmatmul.bf16.gmra.mxu0 %v2456_v61  ;;  %p1912_p8 = pneg %p1911_p5 }
  0x87   : > { %811 = vmatmul.bf16.gmra.mxu3 %v2461_v3  ;;  %879 = vmatpush.bf16.msrb.mxu0 %v1369_v4 }
  0x88   : > { %850 = vmatpush.bf16.msrb.mxu3 %v1461_v5  ;;  %801 = vmatmul.bf16.gmra.mxu1 %v2463_v7  ;;  %p1917_p9 = pnand %p1916_p7, %p1912_p8 }
  0x89   : > { %908 = vmatpush.bf16.msrb.mxu1 %v1465_v12 }
  0x8a   : > { %822 = vmatpush.bf16.msrb.mxu2 %v1353_v11 }
  0x8b   : > { %880 = vmatpush.bf16.msrb.mxu0 %v1357_v19 }
  0x8c   : > { %851 = vmatpush.bf16.msrb.mxu3 %v1449_v20 }
  0x8d   : > { %909 = vmatpush.bf16.msrb.mxu1 %v1453_v24 }
  0x8e   : > { %823 = vmatpush.bf16.msrb.mxu2 %v1341_v23 }
  0x8f   : > { %881 = vmatpush.bf16.msrb.mxu0 %v1345_v31 }
  0x90   : > { %852 = vmatpush.bf16.msrb.mxu3 %v1437_v32 }
  0x91   : > { %910 = vmatpush.bf16.msrb.mxu1 %v1441_v36 }
  0x92   : > { %824 = vmatpush.bf16.msrb.mxu2 %v1329_v35 }
  0x93   : > { %882 = vmatpush.bf16.msrb.mxu0 %v1333_v41 }
  0x94   : > { %853 = vmatpush.bf16.msrb.mxu3 %v1425_v42 }
  0x95   : > { %911 = vmatpush.bf16.msrb.mxu1 %v1429_v43  ;;  %825 = vmatmul.bf16.vlgmr.msrb.gmra.mxu2 %v2404_v2 }
  0x96   : > { %883 = vmatmul.bf16.vlgmr.msrb.gmra.mxu0 %v2404_v2  ;;  %v455_v2 = vld [vmem:[%s329_s7] sm:$0x7] }
  0x97   : > { %854 = vmatmul.bf16.vlgmr.msrb.gmra.mxu3 %v2413_v10  ;;  %v2555_v18 = vperm.slane %v455_v2, 2  ;;  %v2559_v21 = vperm.slane %v455_v2, 1 }
  0x98   : > { %912 = vmatmul.bf16.vlgmr.msrb.gmra.mxu1 %v2413_v10 }
  0xa5   : > { %830 = vmatmul.bf16.gmra.mxu2 %v2456_v61 }
  0xa6   : > { %888 = vmatmul.bf16.gmra.mxu0 %v2456_v61 }
  0xa7   : > { %859 = vmatmul.bf16.gmra.mxu3 %v2463_v7 }
  0xa8   : > { %917 = vmatmul.bf16.gmra.mxu1 %v2463_v7 }
  0xb5   : > { %835 = vmatmul.bf16.gmra.mxu2 %v2402_v1 }
  0xb6   : > { %893 = vmatmul.bf16.gmra.mxu0 %v2402_v1  ;;  %v457_v1 = vperm.slane %v455_v2, 0 }
  0xb7   : > { %864 = vmatmul.bf16.gmra.mxu3 %v2409_v6 }
  0xb8   : > { %922 = vmatmul.bf16.gmra.mxu1 %v2409_v6 }
  0xc5   : > { %840 = vmatmul.bf16.gmra.mxu2 %v2454_v60 }
  0xc6   : > { %898 = vmatmul.bf16.gmra.mxu0 %v2454_v60 }
  0xc7   : > { %869 = vmatmul.bf16.gmra.mxu3 %v2461_v3 }
  0xc8   : > { %927 = vmatmul.bf16.gmra.mxu1 %v2461_v3 }
  0xf2   : > { %v768_v10 = vpop.f32.mrf.mxu0 }
  0xf3   : > { %v769_v45 = vadd.f32 %v768_v10, %v457_v1 }
  0xf5   : > { %v797_v44 = vpop.f32.mrf.mxu1 }
  0xf6   : > { %v2510_v48 = vadd.f32 %v797_v44, %v769_v45 }
  0xf8   : > { %v778_v46 = vpop.f32.mrf.mxu2 }
  0xf9   : > { %v807_v6 = vpop.f32.mrf.mxu3  ;;  %v779_v52 = vadd.f32 %v778_v46, %v457_v1 }
  0xfa   : > { %v770_v47 = vpop.f32.mrf.mxu0 }
  0xfb   : > { %v771_v49 = vadd.f32 %v770_v47, %v457_v1  ;;  %v2524_v58 = vadd.f32 %v807_v6, %v779_v52 }
  0xfd   : > { %v799_v50 = vpop.f32.mrf.mxu1 }
  0xfe   : > { %v2516_v51 = vadd.f32 %v799_v50, %v771_v49 }
 0x100   : > { %v1586_v53 = vpack.c.bf16 %v2516_v51, %v2510_v48  ;;  %v780_v54 = vpop.f32.mrf.mxu2 }
 0x101   : > { %v781_v55 = vadd.f32 %v780_v54, %v457_v1  ;;  %v809_v56 = vpop.f32.mrf.mxu3 }
 0x102   : > { %1587 = vst [vmem:[%s2521_s8] sm:$0xff] %v1586_v53  }
 0x103   : > { %v773_v57 = vpop.f32.mrf.mxu0  ;;  %v2526_v59 = vadd.f32 %v809_v56, %v781_v55 }
 0x104   : > { %v774_v62 = vadd.f32 %v773_v57, %v457_v1 }
 0x105   : > { %v802_v60 = vpop.f32.mrf.mxu1  ;;  %v1596_v61 = vpack.c.bf16 %v2526_v59, %v2524_v58 }
 0x106   : > { %v2533_v4 = vadd.f32 %v802_v60, %v774_v62 }
 0x107   : > { %1624 = vst [vmem:[%s2521_s8 + $0x10] sm:$0xff] %v1596_v61  }
 0x108   : > { %v783_v63 = vpop.f32.mrf.mxu2 }
 0x109   : > { %v784_v9 = vadd.f32 %v783_v63, %v457_v1 }
 0x10a   : > { %v812_v0 = vpop.f32.mrf.mxu3 }
 0x10b   : > { %v775_v3 = vpop.f32.mrf.mxu0  ;;  %v2551_v16 = vadd.f32 %v812_v0, %v784_v9 }
 0x10c   : > { %v776_v5 = vadd.f32 %v775_v3, %v457_v1 }
 0x10d   : > { %v804_v7 = vpop.f32.mrf.mxu1 }
 0x10e   : > { %v2537_v8 = vadd.f32 %v804_v7, %v776_v5 }
 0x110   : > { %v1591_v11 = vpack.c.bf16 %v2537_v8, %v2533_v4  ;;  %v785_v12 = vpop.f32.mrf.mxu2 }
 0x111   : > { %v786_v13 = vadd.f32 %v785_v12, %v457_v1 }
 0x112   : > { %1623 = vst [vmem:[%s2521_s8 + $0x8] sm:$0xff] %v1591_v11   ;;  %v814_v14 = vpop.f32.mrf.mxu3 }
 0x113   : > { %v884_v15 = vpop.f32.mrf.mxu0  ;;  %v2553_v17 = vadd.f32 %v814_v14, %v786_v13 }
 0x114   : > { %v885_v22 = vadd.f32 %v884_v15, %v2555_v18 }
 0x115   : > { %v913_v19 = vpop.f32.mrf.mxu1  ;;  %v1601_v20 = vpack.c.bf16 %v2553_v17, %v2551_v16 }
 0x117   : > { %1625 = vst [vmem:[%s2521_s8 + $0x18] sm:$0xff] %v1601_v20  }
 0x118   : > { %v826_v23 = vpop.f32.mrf.mxu2 }
 0x119   : > { %1920 = shalt.err (!%p1917_p9)
}
 0x11a   : > { %s2110_s24 = smov 64   ;;  %s2111_s21 = smov 128   ;;  %v827_v24 = vadd.f32 %v826_v23, %v2559_v21  ;;  %v855_v25 = vpop.f32.mrf.mxu3  ;;  %v914_v27 = vadd.f32 %v913_v19, %v885_v22 }
 0x11b   : > { %s2112_s8 = smov 4   ;;  %v886_v26 = vpop.f32.mrf.mxu0  ;;  %s2584_s14 = scalar_lea.vmem [#allocation9], %s2514_s15 }
 0x11c   : > { %1655 = dma.vmem_to_hbm [thread:$0]  (%p2304_p2), %s2549_s3, 512, %s1027_s1, %s998_s18, %s2110_s24, %s2111_s21, %s2112_s8   ;;  %v856_v28 = vadd.f32 %v855_v25, %v827_v24  ;;  %v887_v29 = vadd.f32 %v886_v26, %v2555_v18 }
 0x11d   : > { %v915_v30 = vpop.f32.mrf.mxu1  ;;  %s2589_s27 = scalar_lea.vmem [#allocation11], %s2514_s15  ;;  %s2780_s17 = sld [smem:[#allocation31_spill]] }
 0x11e   : > { %v933_v31 = vpack.c.bf16 %v856_v28, %v2510_v48  ;;  %v916_v32 = vadd.f32 %v915_v30, %v887_v29  ;;  %s2781_s18 = sld [smem:[#allocation32_spill]]  ;;  %s1045_s26 = sshll.u32 %s2584_s14, 4  ;;  %s1046_s26 = int_to_ptr.vmem [resolvable:$true] %s1045_s26 }
 0x11f   : > { %s1066_s13 = sshll.u32 %s2589_s27, 4  ;;  %s2638_s7 = scalar_lea.sflag [#allocation10], %s315_s0  ;;  %s2632_s13 = int_to_ptr.vmem [resolvable:$true] %s1066_s13 }
 0x120   : > { %v965_v33 = vrot.slane %v933_v31, 4  ;;  %v1606_v34 = vpack.c.bf16 %v916_v32, %v914_v27  ;;  %v828_v35 = vpop.f32.mrf.mxu2 }
 0x121   : > { %v829_v36 = vadd.f32 %v828_v35, %v2559_v21 }
 0x122   : > { %981 = vst [vmem:[%s2584_s14] sm:$0xf] %v965_v33  ;;  %v857_v37 = vpop.f32.mrf.mxu3 }
 0x123   : > { %1607 = vst [vmem:[%s2589_s27] sm:$0xff] %v1606_v34   ;;  %v889_v38 = vpop.f32.mrf.mxu0  ;;  %v858_v39 = vadd.f32 %v857_v37, %v829_v36  ;;  %s1044_s12 = scalar_lea.hbm %s2780_s17, %s2535_s5 }
 0x124   : > { %v890_v43 = vadd.f32 %v889_v38, %v2555_v18  ;;  %s2782_s10 = smov %s2781_s18  ;;  %s1065_s20 = scalar_lea.hbm %s2781_s18, %s2535_s5 }
 0x125   : > { %v918_v40 = vpop.f32.mrf.mxu1  ;;  %v935_v41 = vpack.c.bf16 %v858_v39, %v2516_v51  ;;  %s1047_s30 = sshll.u32 %s1044_s12, 4  ;;  %s2630_s11 = sshll.u32 %s1065_s20, 4  ;;  %s1048_s30 = int_to_ptr.hbm [resolvable:$true] %s1047_s30  ;;  %s1069_s11 = int_to_ptr.hbm [resolvable:$true] %s2630_s11 }
 0x126   : > { %v919_v45 = vadd.f32 %v918_v40, %v890_v43  ;;  %s1935_s5 = sshra.s32 %s1048_s30, 4  ;;  %s1941_s12 = scalar_lea.hbm %s2780_s17, 128  ;;  %s1936_s5 = int_to_ptr.hbm [resolvable:$true] %s1935_s5 }
 0x127   : > { %v966_v42 = vrot.slane %v935_v41, 4  ;;  %s1937_s15 = scalar_lea.hbm %s1936_s5, 32  ;;  %p1942_p13 = scmp.lt.s32.totalorder %s1936_s5, %s2780_s17 }
 0x128   : > { %v831_v2 = vpop.f32.mrf.mxu2  ;;  %p1938_p10 = scmp.ne.s32.totalorder %s1936_s5, %s1937_s15  ;;  %p1943_p0 = scmp.lt.s32.totalorder %s1941_s12, %s1937_s15 }
 0x129   : > { %982 = vst [vmem:[%s2584_s14 + $0x4] sm:$0xf] %v966_v42  ;;  %v832_v10 = vadd.f32 %v831_v2, %v2559_v21 }
 0x12a   : > { %v860_v44 = vpop.f32.mrf.mxu3  ;;  %p1939_p11 = pnand %p1938_p10, %p2304_p2  ;;  %p1944_p4 = por %p1943_p0, %p1942_p13 }
 0x12b   : > { %v891_v1 = vpop.f32.mrf.mxu0  ;;  %v861_v46 = vadd.f32 %v860_v44, %v832_v10 }
 0x12c   : > { %v892_v6 = vadd.f32 %v891_v1, %v2555_v18  ;;  %p1940_p12 = pneg %p1939_p11 }
 0x12d   : > { %v920_v47 = vpop.f32.mrf.mxu1  ;;  %v937_v48 = vpack.c.bf16 %v861_v46, %v2533_v4 }
 0x12e   : > { %v921_v49 = vadd.f32 %v920_v47, %v892_v6  ;;  %p1945_p5 = pnand %p1944_p4, %p1940_p12 }
 0x12f   : > { %v967_v50 = vrot.slane %v937_v48, 4 }
 0x130   : > { %v1611_v51 = vpack.c.bf16 %v921_v49, %v919_v45  ;;  %v833_v52 = vpop.f32.mrf.mxu2 }
 0x131   : > { %983 = vst [vmem:[%s2584_s14 + $0x8] sm:$0xf] %v967_v50  ;;  %v834_v53 = vadd.f32 %v833_v52, %v2559_v21 }
 0x132   : > { %v862_v54 = vpop.f32.mrf.mxu3  ;;  %1626 = vst [vmem:[%s2589_s27 + $0x8] sm:$0xff] %v1611_v51  }
 0x133   : > { %v894_v55 = vpop.f32.mrf.mxu0  ;;  %v863_v56 = vadd.f32 %v862_v54, %v834_v53 }
 0x134   : > { %v895_v62 = vadd.f32 %v894_v55, %v2555_v18 }
 0x135   : > { %v923_v57 = vpop.f32.mrf.mxu1  ;;  %v939_v60 = vpack.c.bf16 %v863_v56, %v2537_v8 }
 0x136   : > { %v924_v5 = vadd.f32 %v923_v57, %v895_v62 }
 0x137   : > { %v968_v61 = vrot.slane %v939_v60, 4 }
 0x138   : > { %v836_v63 = vpop.f32.mrf.mxu2 }
 0x139   : > { %984 = vst [vmem:[%s2584_s14 + $0xc] sm:$0xf] %v968_v61  ;;  %v837_v0 = vadd.f32 %v836_v63, %v2559_v21 }
 0x13a   : > { %v865_v3 = vpop.f32.mrf.mxu3 }
 0x13b   : > { %v896_v4 = vpop.f32.mrf.mxu0  ;;  %v866_v7 = vadd.f32 %v865_v3, %v837_v0 }
 0x13c   : > { %v897_v9 = vadd.f32 %v896_v4, %v2555_v18 }
 0x13d   : > { %v925_v11 = vpop.f32.mrf.mxu1  ;;  %v941_v12 = vpack.c.bf16 %v866_v7, %v2524_v58 }
 0x13e   : > { %v926_v8 = vadd.f32 %v925_v11, %v897_v9 }
 0x13f   : > { %v969_v13 = vrot.slane %v941_v12, 4 }
 0x140   : > { %v1616_v14 = vpack.c.bf16 %v926_v8, %v924_v5  ;;  %v838_v15 = vpop.f32.mrf.mxu2 }
 0x141   : > { %985 = vst [vmem:[%s2584_s14 + $0x10] sm:$0xf] %v969_v13  ;;  %v839_v19 = vadd.f32 %v838_v15, %v2559_v21 }
 0x142   : > { %v867_v20 = vpop.f32.mrf.mxu3  ;;  %1627 = vst [vmem:[%s2589_s27 + $0x10] sm:$0xff] %v1616_v14  }
 0x143   : > { %v899_v22 = vpop.f32.mrf.mxu0  ;;  %v868_v23 = vadd.f32 %v867_v20, %v839_v19 }
 0x144   : > { %v900_v27 = vadd.f32 %v899_v22, %v2555_v18 }
 0x145   : > { %v928_v24 = vpop.f32.mrf.mxu1  ;;  %v943_v25 = vpack.c.bf16 %v868_v23, %v2526_v59 }
 0x146   : > { %v929_v31 = vadd.f32 %v928_v24, %v900_v27 }
 0x147   : > { %v970_v26 = vrot.slane %v943_v25, 4 }
 0x148   : > { %v841_v58 = vpop.f32.mrf.mxu2 }
 0x149   : > { %986 = vst [vmem:[%s2584_s14 + $0x14] sm:$0xf] %v970_v26  ;;  %v842_v28 = vadd.f32 %v841_v58, %v2559_v21 }
 0x14a   : > { %v870_v29 = vpop.f32.mrf.mxu3 }
 0x14b   : > { %v901_v30 = vpop.f32.mrf.mxu0  ;;  %v871_v32 = vadd.f32 %v870_v29, %v842_v28 }
 0x14c   : > { %v902_v33 = vadd.f32 %v901_v30, %v2555_v18 }
 0x14d   : > { %v930_v59 = vpop.f32.mrf.mxu1  ;;  %v945_v34 = vpack.c.bf16 %v871_v32, %v2551_v16 }
 0x14e   : > { %v931_v35 = vadd.f32 %v930_v59, %v902_v33 }
 0x14f   : > { %v971_v36 = vrot.slane %v945_v34, 4 }
 0x150   : > { %v1621_v37 = vpack.c.bf16 %v931_v35, %v929_v31  ;;  %v843_v38 = vpop.f32.mrf.mxu2 }
 0x151   : > { %987 = vst [vmem:[%s2584_s14 + $0x18] sm:$0xf] %v971_v36  ;;  %v844_v39 = vadd.f32 %v843_v38, %v2559_v21 }
 0x152   : > { %1628 = vst [vmem:[%s2589_s27 + $0x18] sm:$0xff] %v1621_v37   ;;  %v872_v40 = vpop.f32.mrf.mxu3 }
 0x153   : > { %v873_v16 = vadd.f32 %v872_v40, %v844_v39 }
 0x155   : > { %v947_v18 = vpack.c.bf16 %v873_v16, %v2553_v17 }
 0x157   : > { %v972_v21 = vrot.slane %v947_v18, 4 }
 0x159   : > { %988 = vst [vmem:[%s2584_s14 + $0x1c] sm:$0xf] %v972_v21 }
 0x15a   : > { %1948 = shalt.err (!%p1945_p5)
}
 0x15b   : > { %1656 = dma.vmem_to_hbm [thread:$0]  (%p2304_p2), %s1046_s26, 512, %s1048_s30, %s2638_s7, %s2110_s24, %s2111_s21, %s2112_s8  }
 0x15c   : > { %s1963_s16 = sshra.s32 %s1069_s11, 4  ;;  %s1969_s20 = scalar_lea.hbm %s2782_s10, 128  ;;  %s1964_s16 = int_to_ptr.hbm [resolvable:$true] %s1963_s16 }
 0x15d   : > { %s1965_s0 = scalar_lea.hbm %s1964_s16, 32  ;;  %p1970_p7 = scmp.lt.s32.totalorder %s1964_s16, %s2782_s10 }
 0x15e   : > { %p1966_p8 = scmp.ne.s32.totalorder %s1964_s16, %s1965_s0  ;;  %p1971_p9 = scmp.lt.s32.totalorder %s1969_s20, %s1965_s0 }
 0x160   : > { %p1967_p1 = pnand %p1966_p8, %p2304_p2  ;;  %p1972_p10 = por %p1971_p9, %p1970_p7 }
 0x162   : > { %p1968_p3 = pneg %p1967_p1 }
 0x164   : > { %p1973_p11 = pnand %p1972_p10, %p1968_p3 }
 0x166   : > { %1976 = shalt.err (!%p1973_p11)
}
 0x167   : > { %1657 = dma.vmem_to_hbm [thread:$0]  (%p2304_p2), %s2632_s13, 512, %s1069_s11, %s2638_s7, %s2110_s24, %s2111_s21, %s2112_s8  }
 0x168 PF: > { %s2783_s26 = sld [smem:[#allocation16_spill]]  ;;  %p1682_p12 = scmp.ge.s32.totalorder %s2103_s6, 2 }
 0x16a   : > { %p1672_p13 = pnand %p1682_p12, %p2313_p6 }
 0x16c   : > { %p1673_p0 = pneg %p1672_p13 }
 0x16e   : > { %s1083_s27 = sand.u32 1, %s2783_s26  }
 0x16f   : > { %s1084_s28 = scalar_lea.sflag [#allocation4], %s1083_s27 }
 0x170   : > { %2042 = dma.done.wait (%p1673_p0), %s1084_s28, 512  }
 0x171   : > { %2044 = vsyncadd (%p1673_p0), %s1084_s28, 4294966784  ;;  %s2785_s4 = sadd.s32 4294967294, %s2103_s6  }
 0x172   : > { %s1093_s12 = sand.u32 1, %s2785_s4  }
 0x173   : > { %s1094_s3 = scalar_lea.sflag [#allocation10], %s1093_s12 }
 0x174   : > { %2046 = dma.done.wait (%p1673_p0), %s1094_s3, 1024  }
 0x175   : > { %2048 = vsyncadd (%p1673_p0), %s1094_s3, 4294966272  ;;  %s28_s6 = sadd.s32 1, %s2103_s6   ;;  %s2787_s21 = sld [smem:[#allocation17_spill]] }
 0x176   : > { %p2680_p2 = scmp.ge.s32.totalorder %s28_s6, 6   ;;  %s2788_s20 = sld [smem:[#allocation25_spill]] }
 0x177   : > { %s2789_s8 = sld [smem:[#allocation23_spill]]  ;;  %s2796_s18 = smov %s2055_s19 }
 0x178   : > { %s2790_s13 = sld [smem:[#allocation18_spill]]  ;;  %s2801_s24 = smov %s2079_s25 }
 0x179   : > { %s2791_s26 = sld [smem:[#allocation24_spill]]  ;;  %s2803_s27 = smov %s2095_s29 }
 0x17a   : > { %s2792_s28 = sld [smem:[#allocation20_spill]] }
 0x17b   : > { %s2793_s11 = sld [smem:[#allocation21_spill]]  ;;  %s2797_s19 = smov %s2787_s21 }
 0x17c   : > { %s2794_s30 = sld [smem:[#allocation22_spill]]  ;;  %s2798_s21 = smov %s2067_s22 }
 0x17d   : > { %s2799_s22 = smov %s2071_s23  ;;  %s2800_s23 = smov %s2789_s8 }
 0x17e   : > { %s2802_s25 = smov %s2790_s13  ;;  %27 = sbr.rel (!%p2680_p2) target bundleno = 20 (0x14), region = 133 }
 0x181   : > { %s2804_s29 = smov %s2793_s11 }
 0x183   :  { %1110 = vsyncpa [#allocation3], 1 }
 0x184   :  { %1112 = vsyncpa [#allocation3 + $0x1], 1 }
 0x185   :  { %1113 = vsyncpa [#allocation6], 1 }
 0x186   :  { %1115 = vsyncpa [#allocation6 + $0x1], 1 }
 0x187   :  { %1116 = vsyncpa [#allocation4], 1 }
 0x188   :  { %1118 = vsyncpa [#allocation4 + $0x1], 1 }
 0x189   :  { %1119 = vsyncpa [#allocation10], 1 }
 0x18a   :  { %1121 = vsyncpa [#allocation10 + $0x1], 1 }

</bundles_post_ra>
